<compile_context>
chip_gen: v6e
topology: v6e:2x2x1
jax: 0.10.0
libtpu: 0.0.40
codegen_flags: <defaults>
</compile_context>

<pallas_src>
import math
import jax
import jax.numpy as jnp
from jax.experimental import pallas as pl
from jax.experimental.pallas import tpu as pltpu


def _diffusion_loss_kernel(alpha_ref,   # VMEM (ROWS, 1)     f32 : sqrt(sigmoid(log_snr)) per (b,c) row
                           sigma_ref,   # VMEM (ROWS, 1)     f32 : sqrt(sigmoid(-log_snr)) per row
                           bias_ref,    # VMEM (ROWS, 1)     f32 : per-row denoiser bias
                           img_ref,     # VMEM (ROWS, HWT)   f32 : image rows in [0,1]
                           noise_ref,   # VMEM (ROWS, HWT)   f32 : gaussian noise rows
                           w_ref,       # VMEM (ROWS, ROWS)  bf16: block-diag 1x1-conv weight
                           out_ref):    # VMEM (1, 1, HWT)   f32 : column sums of squared error
    # ---- normalize_to_neg_one_to_one + q_sample (f32 on the VPU) ----
    x0 = img_ref[...] * 2.0 - 1.0                              # (ROWS, HWT)
    noise = noise_ref[...]                                     # (ROWS, HWT)
    x_noised = x0 * alpha_ref[...] + noise * sigma_ref[...]    # (ROWS, HWT)

    # ---- denoiser model(x_noised, log_snr) ----
    # TODO(synk): the real `model` is an external U-Net passed into __init__; here it is a
    # deterministic synthetic stand-in: a 1x1 conv (channel mixing, applied to the whole
    # batch tile at once through a block-diagonal weight) plus a per-(b,c) bias derived
    # from a sinusoidal log-snr embedding (precomputed in the wrapper).
    # bf16 operands feed the MXU natively; accumulation stays f32.
    model_out = jnp.dot(w_ref[...], x_noised.astype(jnp.bfloat16),
                        preferred_element_type=jnp.float32) + bias_ref[...]

    # ---- squared error, reduced over the row (sublane) axis; mean finished in wrapper ----
    d = model_out - noise
    out_ref[...] = jnp.sum(d * d, axis=0, keepdims=True)[None]   # (1, 1, HWT) lane-dense store


# ----------------------------- tiling / VMEM heuristics -----------------------------

def _vmem_capacity_bytes():
    """Generation dispatch: 128 MiB on v5e/v6e, 64 MiB on v7x (safe default)."""
    try:
        info = pltpu.get_tpu_info()
        cap = getattr(info, "vmem_capacity_bytes", None)
        if cap:
            return int(cap)
    except Exception:
        pass
    return 64 * 1024 * 1024


def _per_step_vmem_bytes(rows, hw_tile):
    """Per-grid-step VMEM working set: double-buffered f32 streams, in-kernel f32
    intermediates (x0 / x_noised / model_out / diff), the bf16 MXU operand copy,
    the (double-buffered) resident bf16 weight, the output block and the tiny
    per-row inputs."""
    streams = 2 * 2 * rows * hw_tile * 4        # img + noise, 2-deep pipeline
    interm = 4 * rows * hw_tile * 4             # f32 temporaries
    mxu_in = 2 * rows * hw_tile * 2             # bf16 copy of x_noised (+ headroom)
    weight = 2 * rows * rows * 2                # block-diagonal bf16 weight
    out = 2 * hw_tile * 4
    small = 2 * 3 * rows * 4
    return streams + interm + mxu_in + weight + out + small


def _pick_batch_tile(B, C, HW, budget):
    """rows = batch_tile * C; cap at the MXU native tile (128), require sublane alignment
    (rows % 8 == 0 for f32, or rows == B*C full extent) and prefer >= 2 grid steps along
    the batch axis so the pipeline / megacore split stay active."""
    divisors = [bt for bt in range(B, 0, -1) if B % bt == 0]
    min_hw = min(HW, 128)

    def ok(bt, need_multi):
        rows = bt * C
        if rows > 128:
            return False
        if rows % 8 != 0 and rows != B * C:
            return False
        if _per_step_vmem_bytes(rows, min_hw) > budget:
            return False
        return (B // bt >= 2) or not need_multi

    for need_multi in (True, False):
        for bt in divisors:
            if ok(bt, need_multi):
                return bt
    return 1


def _pick_hw_tile(HW, rows, budget):
    """Largest lane-dense divisor of HW (multiple of 128, or HW itself) fitting VMEM."""
    candidates = [d for d in range(HW, 0, -1)
                  if HW % d == 0 and (d % 128 == 0 or d == HW)]
    for d in candidates:
        if _per_step_vmem_bytes(rows, d) <= budget:
            return d
    return candidates[-1]


# ---------------------------------- main wrapper ----------------------------------

def continuous_time_gaussian_diffusion_loss(img, times, noise, wcc, wt, freqs, phase):
    B, C, H, W = img.shape
    HW = H * W
    t = times.astype(jnp.float32)

    # ----- host-side glue: layout plumbing + O(B)/O(B*C) scalar work -----
    # NOTE: no dtype cast of the big streams (a wrapper-side bf16 cast would add a full
    # extra HBM read+write pass); img / noise stream into the kernel in native f32.
    img_rows = img.reshape(B * C, HW)
    noise_rows = noise.reshape(B * C, HW)

    # noise schedule hoisted out of the per-step path:
    #   v = 1e-4 + 10 t^2, log_snr = -log(expm1(v))
    #   alpha = sqrt(sigmoid(log_snr)) = exp(-v/2)
    #   sigma = sqrt(sigmoid(-log_snr)) = sqrt(-expm1(-v))   (cancellation-free for small t)
    v = 1e-4 + 10.0 * t * t
    log_snr = -jnp.log(jnp.maximum(jnp.expm1(v), 1e-20))
    alpha = jnp.exp(-0.5 * v)
    sigma = jnp.sqrt(-jnp.expm1(-v))
    alpha_rows = jnp.repeat(alpha, C).reshape(B * C, 1)
    sigma_rows = jnp.repeat(sigma, C).reshape(B * C, 1)

    # time-embedding bias of the synthetic denoiser (O(B*C) scalars), hoisted to the wrapper
    emb = jnp.sin(log_snr[:, None] * freqs[0][None, :] + phase[0][None, :])    # (B, EMB)
    bias_rows = (emb @ wt.T).astype(jnp.float32).reshape(B * C, 1)             # (B*C, 1)

    # ----- tiling, sized against this generation's VMEM -----
    vmem_cap = _vmem_capacity_bytes()
    vmem_limit = min(vmem_cap * 3 // 4, 100 * 1024 * 1024)   # ~96 MiB on 128 MiB parts, 48 MiB on v7x
    budget = vmem_limit * 3 // 5                              # headroom for compiler scratch

    batch_tile = _pick_batch_tile(B, C, HW, budget)
    rows = batch_tile * C
    nblk = B // batch_tile
    hw_tile = _pick_hw_tile(HW, rows, budget)
    n_hw = HW // hw_tile
    steps = nblk * n_hw

    # block-diagonal 1x1-conv weight (bf16 MXU operand): applies wcc to every batch
    # element of the tile in a single dot.
    w_bd = jnp.kron(jnp.eye(batch_tile, dtype=jnp.float32),
                    wcc.astype(jnp.float32)).astype(jnp.bfloat16)

    # deepen the stream pipeline once there are enough grid steps to hide short DMAs
    stream_kwargs = {"pipeline_mode": pl.Buffered(3)} if steps >= 4 else {}

    grid_spec = pltpu.PrefetchScalarGridSpec(
        num_scalar_prefetch=0,
        grid=(nblk, n_hw),
        in_specs=[
            pl.BlockSpec((rows, 1), lambda r, h: (r, 0)),                     # alpha per row
            pl.BlockSpec((rows, 1), lambda r, h: (r, 0)),                     # sigma per row
            pl.BlockSpec((rows, 1), lambda r, h: (r, 0)),                     # bias per row
            pl.BlockSpec((rows, hw_tile), lambda r, h: (r, h), **stream_kwargs),   # img rows (f32)
            pl.BlockSpec((rows, hw_tile), lambda r, h: (r, h), **stream_kwargs),   # noise rows (f32)
            pl.BlockSpec((rows, rows), lambda r, h: (0, 0)),                  # block-diag weight (resident)
        ],
        out_specs=pl.BlockSpec((1, 1, hw_tile),
                               lambda r, h: (r * n_hw + h, 0, 0)),            # lane-dense partials
    )

    partial = pl.pallas_call(
        _diffusion_loss_kernel,
        out_shape=jax.ShapeDtypeStruct((steps, 1, hw_tile), jnp.float32),
        grid_spec=grid_spec,
        compiler_params=pltpu.CompilerParams(
            dimension_semantics=("parallel", "parallel"),   # no carried accumulator
            vmem_limit_bytes=int(vmem_limit),
        ),
    )(alpha_rows, sigma_rows, bias_rows, img_rows, noise_rows, w_bd)

    # mean of per-example means == global mean (every example has C*HW elements,
    # min_snr_loss_weight defaults to False)
    return jnp.sum(partial) / float(B * C * HW)


# ----------------------------------- reference -----------------------------------

def _ref_loss(img, times, noise, wcc, wt, freqs, phase):
    """Pure-JAX reference mirroring the PyTorch forward (same synthetic model,
    same bf16 rounding of the matmul operands, f32 accumulation)."""
    B, C, H, W = img.shape
    x0 = img.reshape(B, C, H * W).astype(jnp.float32) * 2.0 - 1.0
    n = noise.reshape(B, C, H * W).astype(jnp.float32)
    t = times.astype(jnp.float32)
    v = 1e-4 + 10.0 * t * t
    log_snr = -jnp.log(jnp.maximum(jnp.expm1(v), 1e-20))            # (B,)
    alpha = jnp.exp(-0.5 * v)[:, None, None]                        # sqrt(sigmoid(log_snr))
    sigma = jnp.sqrt(-jnp.expm1(-v))[:, None, None]                 # sqrt(sigmoid(-log_snr))
    x = x0 * alpha + n * sigma
    emb = jnp.sin(log_snr[:, None] * freqs[0][None, :] + phase[0][None, :])   # (B, EMB)
    bias = emb @ wt.T                                                         # (B, C)
    out = jnp.einsum('ij,bjs->bis',
                     wcc.astype(jnp.bfloat16), x.astype(jnp.bfloat16),
                     preferred_element_type=jnp.float32) + bias[:, :, None]
    losses = jnp.mean((out - n) ** 2, axis=(1, 2))
    return jnp.mean(losses)


if __name__ == "__main__":
    key = jax.random.PRNGKey(0)
    k_img, k_t, k_n, k_wcc, k_wt, k_f = jax.random.split(key, 6)

    B, C, H, W = 2, 4, 16, 16
    EMB = 16
    HALF = EMB // 2

    # module inputs (images in [0, 1] as expected before normalize_to_neg_one_to_one)
    img = jax.random.uniform(k_img, (B, C, H, W), jnp.float32)
    # random_times / torch.randn_like done as host RNG glue (deterministic)
    times = jax.random.uniform(k_t, (B,), jnp.float32)
    noise = jax.random.normal(k_n, (B, C, H, W), jnp.float32)

    # deterministic synthetic denoiser parameters
    wcc = jax.random.normal(k_wcc, (C, C), jnp.float32) * 0.2
    wt = jax.random.normal(k_wt, (C, EMB), jnp.float32) * 0.2
    f = jax.random.normal(k_f, (HALF,), jnp.float32) * 2.0 * math.pi
    freqs = jnp.concatenate([f, f]).reshape(1, EMB).astype(jnp.float32)
    phase = jnp.concatenate([jnp.zeros((HALF,), jnp.float32),
                             jnp.full((HALF,), math.pi / 2, jnp.float32)]).reshape(1, EMB)

    loss = continuous_time_gaussian_diffusion_loss(img, times, noise, wcc, wt, freqs, phase)
    loss = jax.block_until_ready(loss)

    ref = _ref_loss(img, times, noise, wcc, wt, freqs, phase)
    assert jnp.allclose(loss, ref, rtol=1e-3, atol=1e-6), (float(loss), float(ref))

    print("KERNEL_OK")
</pallas_src>

<mosaic_0001>
module attributes {stable_mosaic.version = 11 : i64} {
  func.func @_diffusion_loss_kernel(%arg0: i32, %arg1: i32, %arg2: memref<8x1xf32, #tpu.memory_space<vmem>>, %arg3: memref<8x1xf32, #tpu.memory_space<vmem>>, %arg4: memref<8x1xf32, #tpu.memory_space<vmem>>, %arg5: memref<8x256xf32, #tpu.memory_space<vmem>>, %arg6: memref<8x256xf32, #tpu.memory_space<vmem>>, %arg7: memref<8x8xbf16, #tpu.memory_space<vmem>>, %arg8: memref<1x1x256xf32, #tpu.memory_space<vmem>>) attributes {dimension_semantics = [#tpu.dimension_semantics<parallel>, #tpu.dimension_semantics<parallel>], iteration_bounds = array<i64: 1, 1>, scalar_prefetch = 0 : i64, scratch_operands = 0 : i64, tpu.core_type = #tpu.core_type<tc>, window_params = [{transform_indices = @transform_0, window_bounds = array<i64: 8, 1>}, {transform_indices = @transform_1, window_bounds = array<i64: 8, 1>}, {transform_indices = @transform_2, window_bounds = array<i64: 8, 1>}, {transform_indices = @transform_3, window_bounds = array<i64: 8, 256>}, {transform_indices = @transform_4, window_bounds = array<i64: 8, 256>}, {pipeline_mode = #tpu.pipeline_mode<synchronous>, transform_indices = @transform_5, window_bounds = array<i64: 8, 8>}, {transform_indices = @transform_6, window_bounds = array<i64: 1, 1, 256>}]} {
    %c0 = arith.constant 0 : index
    %c0_0 = arith.constant 0 : index
    %0 = vector.load %arg5[%c0, %c0_0] : memref<8x256xf32, #tpu.memory_space<vmem>>, vector<8x256xf32>
    %cst = arith.constant 2.000000e+00 : f32
    %1 = vector.broadcast %cst : f32 to vector<8x256xf32>
    %2 = arith.mulf %0, %1 : vector<8x256xf32>
    %cst_1 = arith.constant 1.000000e+00 : f32
    %3 = vector.broadcast %cst_1 : f32 to vector<8x256xf32>
    %4 = arith.subf %2, %3 : vector<8x256xf32>
    %c0_2 = arith.constant 0 : index
    %c0_3 = arith.constant 0 : index
    %5 = vector.load %arg6[%c0_2, %c0_3] : memref<8x256xf32, #tpu.memory_space<vmem>>, vector<8x256xf32>
    %c0_4 = arith.constant 0 : index
    %c0_5 = arith.constant 0 : index
    %6 = vector.load %arg2[%c0_4, %c0_5] : memref<8x1xf32, #tpu.memory_space<vmem>>, vector<8x1xf32>
    %7 = vector.broadcast %6 : vector<8x1xf32> to vector<8x256xf32>
    %8 = arith.mulf %4, %7 : vector<8x256xf32>
    %c0_6 = arith.constant 0 : index
    %c0_7 = arith.constant 0 : index
    %9 = vector.load %arg3[%c0_6, %c0_7] : memref<8x1xf32, #tpu.memory_space<vmem>>, vector<8x1xf32>
    %10 = vector.broadcast %9 : vector<8x1xf32> to vector<8x256xf32>
    %11 = arith.mulf %5, %10 : vector<8x256xf32>
    %12 = arith.addf %8, %11 : vector<8x256xf32>
    %c0_8 = arith.constant 0 : index
    %c0_9 = arith.constant 0 : index
    %13 = vector.load %arg7[%c0_8, %c0_9] : memref<8x8xbf16, #tpu.memory_space<vmem>>, vector<8x8xbf16>
    %14 = arith.truncf %12 : vector<8x256xf32> to vector<8x256xbf16>
    %cst_10 = arith.constant dense<0.000000e+00> : vector<8x256xf32>
    %15 = tpu.matmul %13, %14, %cst_10 {dimension_numbers = #tpu.dot_dimension_numbers<[1], [0], [0], [1], [0, 0, 1, 1], [], []>} : vector<8x8xbf16>, vector<8x256xbf16>, vector<8x256xf32> -> vector<8x256xf32>
    %c0_11 = arith.constant 0 : index
    %c0_12 = arith.constant 0 : index
    %16 = vector.load %arg4[%c0_11, %c0_12] : memref<8x1xf32, #tpu.memory_space<vmem>>, vector<8x1xf32>
    %17 = vector.broadcast %16 : vector<8x1xf32> to vector<8x256xf32>
    %18 = arith.addf %15, %17 : vector<8x256xf32>
    %19 = arith.subf %18, %5 : vector<8x256xf32>
    %20 = arith.mulf %19, %19 : vector<8x256xf32>
    %cst_13 = arith.constant dense<0.000000e+00> : vector<256xf32>
    %21 = vector.multi_reduction <add>, %20, %cst_13 [0] : vector<8x256xf32> to vector<256xf32>
    %22 = vector.shape_cast %21 : vector<256xf32> to vector<1x256xf32>
    %23 = vector.shape_cast %22 : vector<1x256xf32> to vector<1x1x256xf32>
    %c0_14 = arith.constant 0 : index
    %c0_15 = arith.constant 0 : index
    %c0_16 = arith.constant 0 : index
    %24 = vector.load %arg8[%c0_14, %c0_15, %c0_16] : memref<1x1x256xf32, #tpu.memory_space<vmem>>, vector<1x1x256xf32>
    tpu.vector_store %arg8[%c0_14, %c0_15, %c0_16], %23 {strides = array<i32>} : memref<1x1x256xf32, #tpu.memory_space<vmem>>, vector<1x1x256xf32>,
    return
  }
  func.func @transform_0(%arg0: i32, %arg1: i32) -> (i32, i32) {
    %c0_i32 = arith.constant 0 : i32
    %c0_i32_0 = arith.constant 0 : i32
    return %arg0, %c0_i32 : i32, i32
  }
  func.func @transform_1(%arg0: i32, %arg1: i32) -> (i32, i32) {
    %c0_i32 = arith.constant 0 : i32
    %c0_i32_0 = arith.constant 0 : i32
    return %arg0, %c0_i32 : i32, i32
  }
  func.func @transform_2(%arg0: i32, %arg1: i32) -> (i32, i32) {
    %c0_i32 = arith.constant 0 : i32
    %c0_i32_0 = arith.constant 0 : i32
    return %arg0, %c0_i32 : i32, i32
  }
  func.func @transform_3(%arg0: i32, %arg1: i32) -> (i32, i32) {
    %c0_i32 = arith.constant 0 : i32
    return %arg0, %arg1 : i32, i32
  }
  func.func @transform_4(%arg0: i32, %arg1: i32) -> (i32, i32) {
    %c0_i32 = arith.constant 0 : i32
    return %arg0, %arg1 : i32, i32
  }
  func.func @transform_5(%arg0: i32, %arg1: i32) -> (i32, i32) {
    %c0_i32 = arith.constant 0 : i32
    %c0_i32_0 = arith.constant 0 : i32
    %c0_i32_1 = arith.constant 0 : i32
    return %c0_i32, %c0_i32_0 : i32, i32
  }
  func.func @transform_6(%arg0: i32, %arg1: i32) -> (i32, i32, i32) {
    %c1_i32 = arith.constant 1 : i32
    %0 = arith.muli %arg0, %c1_i32 : i32
    %1 = arith.addi %0, %arg1 : i32
    %c0_i32 = arith.constant 0 : i32
    %c0_i32_0 = arith.constant 0 : i32
    %c0_i32_1 = arith.constant 0 : i32
    return %1, %c0_i32, %c0_i32_0 : i32, i32, i32
  }
}

</mosaic_0001>

<bundles_post_ra>
// kernel: tpu_custom_call.1
= control target key start
LH: loop header
LB: loop body
LE: loop exit
PB: predicated region body
PF: predicated region fallthrough
CT: control target
= control target key end

     0   :  { %v201_v1 = vmov 0   ;;  %s266_s0 = inlined_call_operand.vmem [shape: f32[8,1], index: 0, kind: input, shape index: {}]   ;;  %s267_s1 = inlined_call_operand.vmem [shape: f32[8,1], index: 1, kind: input, shape index: {}]   ;;  %s268_s2 = inlined_call_operand.vmem [shape: f32[8,1], index: 2, kind: input, shape index: {}]   ;;  %s269_s3 = inlined_call_operand.vmem [shape: f32[8,256], index: 3, kind: input, shape index: {}]   ;;  %s270_s4 = inlined_call_operand.vmem [shape: f32[8,256], index: 4, kind: input, shape index: {}]   ;;  %s271_s5 = inlined_call_operand.vmem [shape: bf16[8,8], index: 5, kind: input, shape index: {}]   ;;  %s272_s6 = inlined_call_operand.hbm [shape: f32[1,1,256], index: 6, kind: output, shape index: {}]  }
   0x1   :  { %v34_v0 = vld [vmem:[%s266_s0] sm:$0xff]  ;;  %177 = vset.pattern.permute.xlu0 %v201_v1  ;;  %104 = vmatprep.mubr.bf16.mxu0 %v201_v1 }
   0x2   :  { %37 = vperm.xlu0 %177, %v34_v0   ;;  %178 = vset.pattern.permute.xlu1 %v201_v1 }
   0x3   :  { %11 = vsyncpa [#allocation3], 0  ;;  %v42_v2 = vld [vmem:[%s267_s1] sm:$0xff]  ;;  %v27_v5 = vld [vmem:[%s269_s3 + $0x8] sm:$0xff]  ;;  %vm65_vm0 = vcmask 1043456   ;;  %vm61_vm1 = vcmask 64512   ;;  %v135_v42 = vlaneseq }
   0x4   :  { %v55_v3 = vld [vmem:[%s268_s2] sm:$0xff]  ;;  %v29_v7 = vmul.f32 2.0, %v27_v5  ;;  %v33_v12 = vld [vmem:[%s270_s4 + $0x8] sm:$0xff]  ;;  %v202_v40 = vmov 1966171168  }
   0x5   :  { %58 = vperm.xlu1 %178, %v55_v3   ;;  %v26_v4 = vld [vmem:[%s269_s3] sm:$0xff]  ;;  %v133_v41 = vunpack.c.l.s4 %v202_v40  ;;  %v136_v48 = vshrl.u32 %v135_v42, 7  ;;  %vm149_vm2 = vcmp.lt.s32.totalorder %v135_v42, 256 }
   0x6   :  { %45 = vperm.xlu0 %177, %v42_v2   ;;  %v28_v6 = vmul.f32 2.0, %v26_v4  ;;  %v171_v10 = vadd.f32 -1.0, %v29_v7  ;;  %v32_v11 = vld [vmem:[%s270_s4] sm:$0xff]  ;;  %s203_s4 = smov [#allocation2]  }
   0x7   :  { %v52_v23 = vld [vmem:[%s271_s5] sm:$0xf]  ;;  %v134_v47 = vunpack.c.0.s8 %v133_v41  ;;  %s162_s5 = sshll.u32 %s203_s4, 4  ;;  %s163_s5 = int_to_ptr.vmem [resolvable:$true] %s162_s5 }
   0x8   :  { %v170_v9 = vadd.f32 -1.0, %v28_v6  ;;  %s179_s9 = scalar_lea.vmem %s163_s5, 32  ;;  %p184_p1 = scmp.lt.s32.totalorder %s163_s5, %s163_s5 }
   0x9   :  { %v137_v52 = vsub.s32 %v134_v47, %v136_v48  ;;  %p180_p0 = scmp.ne.s32.totalorder %s163_s5, %s179_s9  ;;  %p185_p2 = scmp.lt.s32.totalorder %s179_s9, %s179_s9 }
   0xb   :  { %p186_p3 = por %p185_p2, %p184_p1 }
   0xd   :  { %p187_p4 = pnand %p186_p3, %p180_p0 }
  0x7d   :  { %v38_v8 = vpop.permute.xlu0 %37 }
  0x7e   :  { %v40_v14 = vmul.f32 %v170_v9, %v38_v8  ;;  %v41_v15 = vmul.f32 %v171_v10, %v38_v8 }
  0x80   :  { %v59_v24 = vpop.permute.xlu1 %58 }
  0x81   :  { %v46_v13 = vpop.permute.xlu0 %45 }
  0x82   :  { %v48_v16 = vmul.f32 %v46_v13, %v32_v11  ;;  %v49_v17 = vmul.f32 %v46_v13, %v33_v12 }
  0x84   :  { %v50_v18 = vadd.f32 %v48_v16, %v40_v14  ;;  %v51_v19 = vadd.f32 %v49_v17, %v41_v15 }
  0x86   :  { %v54_v20 = vpack.c.bf16 %v51_v19, %v51_v19  ;;  %v53_v21 = vpack.c.bf16 %v50_v18, %v50_v18 }
  0x88   :  { %172 = vmatprep.subr.msk.bf16.mxu0 %vm65_vm0, %v54_v20  ;;  %v67_v22 = vsel %vm65_vm0, %v53_v21, 0 }
  0x89   :  { %87 = vmatpush1.bf16.msra.mxu0 %v67_v22 }
  0x8c   :  { %173 = vmatmul.mubr.msk.bf16.vlgmr.msra.gmra.mxu0 %vm61_vm1, %v52_v23 }
 0x14c   :  { %v106_v25 = vpop.f32.mrf.mxu0 }
 0x14d   :  { %v107_v26 = vadd.f32 %v106_v25, %v59_v24 }
 0x14e   :  { %v108_v27 = vpop.f32.mrf.mxu0 }
 0x14f   :  { %v113_v28 = vsub.f32 %v107_v26, %v32_v11  ;;  %v109_v29 = vadd.f32 %v108_v27, %v59_v24 }
 0x150   :  { %v110_v30 = vpop.f32.mrf.mxu0 }
 0x151   :  { %v115_v31 = vmul.f32 %v113_v28, %v113_v28  ;;  %v114_v32 = vsub.f32 %v109_v29, %v33_v12 }
 0x152   :  { %v111_v33 = vpop.f32.mrf.mxu0 }
 0x153   :  { %v117_v34 = vrot.slane %v115_v31, 4  ;;  %v116_v35 = vmul.f32 %v114_v32, %v114_v32 }
 0x155   :  { %v118_v36 = vadd.f32 %v117_v34, %v115_v31  ;;  %v123_v37 = vrot.slane %v116_v35, 4 }
 0x157   :  { %v119_v38 = vrot.slane %v118_v36, 2  ;;  %v124_v39 = vadd.f32 %v123_v37, %v116_v35 }
 0x159   :  { %v120_v43 = vadd.f32 %v119_v38, %v118_v36  ;;  %v125_v44 = vrot.slane %v124_v39, 2 }
 0x15b   :  { %v121_v45 = vrot.slane %v120_v43, 1  ;;  %v126_v46 = vadd.f32 %v125_v44, %v124_v39 }
 0x15d   :  { %v127_v49 = vrot.slane %v126_v46, 1  ;;  %v122_v50 = vadd.f32 %v121_v45, %v120_v43 }
 0x15f   :  { %v128_v51 = vadd.f32 %v127_v49, %v126_v46 }
 0x161   :  { %v131_v53 = vcombine.low %v122_v50, %v128_v51 }
 0x163   :  { %v138_v54 = vrot.slane %v131_v53, %v137_v52 }
 0x165   :  { %v145_v55 = vrot.slane %v138_v54, %v137_v52 }
 0x167   :  { %151 = vst.msk [vmem:[#allocation2] sm:$0x3] %vm149_vm2, %v145_v55 }
 0x168   :  { %190 = shalt.err (!%p187_p4)
}
 0x169   :  { %165 = dma.vmem_to_hbm [thread:$0]  %s163_s5, 32, %s272_s6, [#allocation3]  }
 0x16a   :  { %199 = dma.done.wait [#allocation3], 32  }
 0x16b   :  { %200 = vsyncadd [#allocation3], 4294967264 }
 0x16c   :  { %169 = vsyncpa [#allocation3], 1 }

</bundles_post_ra>
